<compile_context>
chip_gen: v7x
topology: tpu7x:2x2x1
jax: 0.10.0
libtpu: 0.0.40
codegen_flags: <defaults>
</compile_context>

<pallas_src>
import functools

import jax
import jax.numpy as jnp
from jax.experimental import pallas as pl
from jax.experimental.pallas import tpu as pltpu


_LANE = 128


def _round_up(x, m):
    return (x + m - 1) // m * m


def _sublane(dtype):
    itemsize = jnp.dtype(dtype).itemsize
    return {4: 8, 2: 16, 1: 32}.get(itemsize, 8)


def _tpu_limits():
    """Best-effort per-TensorCore VMEM capacity and TensorCore count."""
    vmem = 64 * 1024 * 1024            # conservative default (v7x per-TC)
    n_tc = 1
    try:
        info = pltpu.get_tpu_info()
        vmem = int(getattr(info, "vmem_capacity_bytes", vmem))
    except Exception:
        pass
    try:
        kind = jax.devices()[0].device_kind.lower()
        if "v7" in kind or "7x" in kind:
            n_tc = 2                   # two TensorCores share the grid via "parallel"
    except Exception:
        pass
    return vmem, n_tc


def _layernorm(z, gamma, beta, eps, d_real, d_pad):
    """Two-pass LayerNorm over the real feature width (padded lanes masked)."""
    inv_d = jnp.float32(1.0 / d_real)
    mean = jnp.sum(z, axis=-1, keepdims=True) * inv_d
    zc = z - mean
    if d_pad != d_real:
        lane = jax.lax.broadcasted_iota(jnp.int32, z.shape, z.ndim - 1)
        zc = jnp.where(lane < d_real, zc, jnp.float32(0.0))
    var = jnp.sum(zc * zc, axis=-1, keepdims=True) * inv_d
    return zc * jax.lax.rsqrt(var + jnp.float32(eps)) * gamma + beta


def _param_output2_resident_kernel(x_ref, wt_ref, b_ref, g_ref, be_ref, o_ref,
                                   *, eps, d_real, d_pad):
    x = x_ref[...]                                            # (tm, Dp) native dtype
    xm = x if x.dtype == wt_ref.dtype else x.astype(wt_ref.dtype)
    # dense: y = x @ W^T   (MXU, native/low-precision operands, f32 accumulate)
    y = jnp.dot(xm, wt_ref[...], preferred_element_type=jnp.float32)
    # dropout: eval mode == identity.
    # residual + bias, then LayerNorm, all in f32.
    z = y + b_ref[...].astype(jnp.float32) + x.astype(jnp.float32)
    out = _layernorm(z, g_ref[...].astype(jnp.float32),
                     be_ref[...].astype(jnp.float32), eps, d_real, d_pad)
    o_ref[...] = out.astype(o_ref.dtype)


def _param_output2_ktiled_kernel(x_mm_ref, x_res_ref, wt_ref, b_ref, g_ref, be_ref,
                                 o_ref, acc_ref, *, eps, d_real, d_pad):
    k = pl.program_id(1)

    @pl.when(k == 0)
    def _():
        acc_ref[...] = jnp.zeros_like(acc_ref)

    xk = x_mm_ref[...]
    if xk.dtype != wt_ref.dtype:
        xk = xk.astype(wt_ref.dtype)
    acc_ref[...] += jnp.dot(xk, wt_ref[...], preferred_element_type=jnp.float32)

    @pl.when(k == pl.num_programs(1) - 1)
    def _():
        z = (acc_ref[...]
             + b_ref[...].astype(jnp.float32)
             + x_res_ref[...].astype(jnp.float32))
        out = _layernorm(z, g_ref[...].astype(jnp.float32),
                         be_ref[...].astype(jnp.float32), eps, d_real, d_pad)
        o_ref[...] = out.astype(o_ref.dtype)


def prepare_param_output2(weight, bias, ln_gamma, ln_beta, matmul_dtype=None):
    """One-time parameter prep: transpose the Linear weight (D_out, D_in) -> W^T and
    zero-pad the feature axis to a lane multiple (128).  Do NOT redo this per call.
    matmul_dtype (e.g. jnp.bfloat16) optionally stores W^T in low precision for the
    MXU (opt-in precision tradeoff; accumulation stays f32)."""
    d = weight.shape[0]
    dp = _round_up(d, _LANE)
    wt = weight.T
    if dp != d:
        wt = jnp.pad(wt, ((0, dp - d), (0, dp - d)))
        bias = jnp.pad(bias, (0, dp - d))
        ln_gamma = jnp.pad(ln_gamma, (0, dp - d))
        ln_beta = jnp.pad(ln_beta, (0, dp - d))
    if matmul_dtype is not None:
        wt = wt.astype(matmul_dtype)
    return dict(
        wt=wt,
        b=bias.reshape(1, dp),
        gamma=ln_gamma.reshape(1, dp),
        beta=ln_beta.reshape(1, dp),
        d=d,
        dp=dp,
    )


def param_output2(x, params, *, eps=1e-12, row_tile=None):
    """Fused Linear + (eval) dropout + residual + LayerNorm.  x: (..., D)."""
    orig_shape = x.shape
    d, dp = params["d"], params["dp"]
    assert orig_shape[-1] == d, "feature dim mismatch with prepared params"

    x2 = x.reshape(-1, d)
    n = x2.shape[0]
    dtype = x.dtype
    itemsize = jnp.dtype(dtype).itemsize
    sub = _sublane(dtype)

    if dp != d:
        # Lane-dense feature axis so stores are unmasked full-lane vst.
        x2 = jnp.pad(x2, ((0, 0), (0, dp - d)))

    wt = params["wt"]
    wbytes = jnp.dtype(wt.dtype).itemsize

    vmem_cap, n_tc = _tpu_limits()
    budget = int(0.85 * vmem_cap)          # per-TC budget (each TC holds its own copies)
    param_bytes = 8 * dp * 4               # bias/gamma/beta rows (generous)

    weight_bytes = dp * dp * wbytes        # single-buffered resident weight
    # Per-row VMEM cost: double-buffered x + out tiles and ~4 live f32 intermediates.
    per_row = dp * (4 * itemsize + 4 * 4)

    resident_ok = weight_bytes + param_bytes + sub * per_row <= budget

    if n < sub:
        rows_cap = n                       # single full-height block (== full array dim)
    else:
        rows_cap = max(sub, (((n + n_tc - 1) // n_tc) // sub) * sub)

    if row_tile is not None:
        assert row_tile == n or row_tile % sub == 0, \
            "row_tile must be a multiple of the sublane packing (or equal the row count)"

    if resident_ok:
        if row_tile is None:
            avail = max(budget - weight_bytes - param_bytes, sub * per_row)
            fit_rows = max(sub, (avail // per_row) // sub * sub)
            target = 1024 if dp <= 1024 else 256
            row_tile = max(1, min(target, fit_rows, rows_cap))
        need = 2 * weight_bytes + param_bytes + row_tile * per_row
        vmem_limit = min(budget, max(int(need), 16 * 1024 * 1024))
        kernel = functools.partial(_param_output2_resident_kernel,
                                   eps=eps, d_real=d, d_pad=dp)

        def call(use_buffered):
            const = {"pipeline_mode": pl.Buffered(1)} if use_buffered else {}
            in_specs = [
                pl.BlockSpec((row_tile, dp), lambda i: (i, 0)),          # x rows (pipelined)
                pl.BlockSpec((dp, dp), lambda i: (0, 0), **const),       # W^T (resident)
                pl.BlockSpec((1, dp), lambda i: (0, 0), **const),        # bias
                pl.BlockSpec((1, dp), lambda i: (0, 0), **const),        # ln gamma
                pl.BlockSpec((1, dp), lambda i: (0, 0), **const),        # ln beta
            ]
            return pl.pallas_call(
                kernel,
                out_shape=jax.ShapeDtypeStruct((n, dp), dtype),
                grid_spec=pltpu.PrefetchScalarGridSpec(
                    num_scalar_prefetch=0,
                    grid=(pl.cdiv(n, row_tile),),
                    in_specs=in_specs,
                    out_specs=pl.BlockSpec((row_tile, dp), lambda i: (i, 0)),
                ),
                compiler_params=pltpu.CompilerParams(
                    dimension_semantics=("parallel",),
                    vmem_limit_bytes=int(vmem_limit),
                ),
            )(x2, wt, params["b"], params["gamma"], params["beta"])

    else:
        # Large-D path (e.g. v7x 64 MiB VMEM): K-tiled weight, full-width f32 accumulator.
        tk = _LANE
        for cand in (512, 256, 128):
            if dp % cand == 0:
                tk = cand
                break
        per_row_k = dp * (4 * itemsize + 4 * 4) + 2 * tk * itemsize
        while (2 * tk * dp * wbytes + param_bytes + sub * per_row_k > budget) and tk > _LANE:
            tk //= 2
            per_row_k = dp * (4 * itemsize + 4 * 4) + 2 * tk * itemsize
        if row_tile is None:
            avail = max(budget - 2 * tk * dp * wbytes - param_bytes, sub * per_row_k)
            fit_rows = max(sub, (avail // per_row_k) // sub * sub)
            row_tile = max(1, min(256, fit_rows, rows_cap))
        need = 2 * tk * dp * wbytes + param_bytes + row_tile * per_row_k
        vmem_limit = min(budget, max(int(need), 16 * 1024 * 1024))
        kernel = functools.partial(_param_output2_ktiled_kernel,
                                   eps=eps, d_real=d, d_pad=dp)

        def call(use_buffered):
            const = {"pipeline_mode": pl.Buffered(1)} if use_buffered else {}
            in_specs = [
                pl.BlockSpec((row_tile, tk), lambda i, k: (i, k)),       # x, K slice (matmul)
                pl.BlockSpec((row_tile, dp), lambda i, k: (i, 0)),       # x, full row (residual)
                pl.BlockSpec((tk, dp), lambda i, k: (k, 0)),             # W^T, K slice
                pl.BlockSpec((1, dp), lambda i, k: (0, 0), **const),     # bias
                pl.BlockSpec((1, dp), lambda i, k: (0, 0), **const),     # ln gamma
                pl.BlockSpec((1, dp), lambda i, k: (0, 0), **const),     # ln beta
            ]
            return pl.pallas_call(
                kernel,
                out_shape=jax.ShapeDtypeStruct((n, dp), dtype),
                grid_spec=pltpu.PrefetchScalarGridSpec(
                    num_scalar_prefetch=0,
                    grid=(pl.cdiv(n, row_tile), dp // tk),
                    in_specs=in_specs,
                    out_specs=pl.BlockSpec((row_tile, dp), lambda i, k: (i, 0)),
                    scratch_shapes=[pltpu.VMEM((row_tile, dp), jnp.float32)],
                ),
                compiler_params=pltpu.CompilerParams(
                    dimension_semantics=("parallel", "arbitrary"),
                    vmem_limit_bytes=int(vmem_limit),
                ),
            )(x2, x2, wt, params["b"], params["gamma"], params["beta"])

    try:
        out = call(True)        # single-buffer the grid-invariant operands
    except Exception:
        out = call(False)       # fallback if pipeline_mode=pl.Buffered isn't supported

    if dp != d:
        out = out[:, :d]
    return out.reshape(orig_shape)


def reference_param_output2(x, weight, bias, ln_gamma, ln_beta, eps=1e-12):
    y = jnp.einsum("...i,oi->...o", x, weight) + bias
    z = y + x
    mean = jnp.mean(z, axis=-1, keepdims=True)
    var = jnp.mean((z - mean) ** 2, axis=-1, keepdims=True)
    return (z - mean) / jnp.sqrt(var + eps) * ln_gamma + ln_beta


if __name__ == "__main__":
    key = jax.random.PRNGKey(0)
    k_x, k_w, k_b, k_g, k_be = jax.random.split(key, 5)

    batch, seq, dim = 2, 8, 32

    x = jax.random.normal(k_x, (batch, seq, dim), dtype=jnp.float32)

    # dense.weight ~ kaiming_normal_; small perturbations on bias/gamma/beta exercise
    # every fused term (forward math unchanged).
    w_std = (2.0 / dim) ** 0.5
    weight = w_std * jax.random.normal(k_w, (dim, dim), dtype=jnp.float32)
    bias = 0.1 * jax.random.normal(k_b, (dim,), dtype=jnp.float32)
    ln_gamma = 1.0 + 0.1 * jax.random.normal(k_g, (dim,), dtype=jnp.float32)
    ln_beta = 0.1 * jax.random.normal(k_be, (dim,), dtype=jnp.float32)

    # One-time parameter prep (transpose + lane padding), reused for every call.
    params = prepare_param_output2(weight, bias, ln_gamma, ln_beta)

    out = jax.block_until_ready(param_output2(x, params))

    ref = reference_param_output2(x, weight, bias, ln_gamma, ln_beta)
    assert out.shape == x.shape
    assert jnp.allclose(out, ref, atol=1e-4, rtol=1e-4), "mismatch vs reference"

    print("KERNEL_OK")
</pallas_src>

<mosaic_0001>
module attributes {stable_mosaic.version = 11 : i64} {
  func.func @_param_output2_resident_kernel(%arg0: i32, %arg1: memref<16x128xf32, #tpu.memory_space<vmem>>, %arg2: memref<128x128xf32, #tpu.memory_space<vmem>>, %arg3: memref<1x128xf32, #tpu.memory_space<vmem>>, %arg4: memref<1x128xf32, #tpu.memory_space<vmem>>, %arg5: memref<1x128xf32, #tpu.memory_space<vmem>>, %arg6: memref<16x128xf32, #tpu.memory_space<vmem>>) attributes {dimension_semantics = [#tpu.dimension_semantics<parallel>], iteration_bounds = array<i64: 1>, scalar_prefetch = 0 : i64, scratch_operands = 0 : i64, tpu.core_type = #tpu.core_type<tc>, window_params = [{transform_indices = @transform_0, window_bounds = array<i64: 16, 128>}, {pipeline_mode = #tpu.pipeline_mode<synchronous>, transform_indices = @transform_1, window_bounds = array<i64: 128, 128>}, {pipeline_mode = #tpu.pipeline_mode<synchronous>, transform_indices = @transform_2, window_bounds = array<i64: 1, 128>}, {pipeline_mode = #tpu.pipeline_mode<synchronous>, transform_indices = @transform_3, window_bounds = array<i64: 1, 128>}, {pipeline_mode = #tpu.pipeline_mode<synchronous>, transform_indices = @transform_4, window_bounds = array<i64: 1, 128>}, {transform_indices = @transform_5, window_bounds = array<i64: 16, 128>}]} {
    %c0 = arith.constant 0 : index
    %c0_0 = arith.constant 0 : index
    %0 = vector.load %arg1[%c0, %c0_0] : memref<16x128xf32, #tpu.memory_space<vmem>>, vector<16x128xf32>
    %c0_1 = arith.constant 0 : index
    %c0_2 = arith.constant 0 : index
    %1 = vector.load %arg2[%c0_1, %c0_2] : memref<128x128xf32, #tpu.memory_space<vmem>>, vector<128x128xf32>
    %cst = arith.constant dense<0.000000e+00> : vector<16x128xf32>
    %2 = tpu.matmul %0, %1, %cst {dimension_numbers = #tpu.dot_dimension_numbers<[1], [0], [0], [1], [0, 0, 1, 1], [], []>} : vector<16x128xf32>, vector<128x128xf32>, vector<16x128xf32> -> vector<16x128xf32>
    %c0_3 = arith.constant 0 : index
    %c0_4 = arith.constant 0 : index
    %3 = vector.load %arg3[%c0_3, %c0_4] : memref<1x128xf32, #tpu.memory_space<vmem>>, vector<1x128xf32>
    %4 = vector.broadcast %3 : vector<1x128xf32> to vector<16x128xf32>
    %5 = arith.addf %2, %4 : vector<16x128xf32>
    %6 = arith.addf %5, %0 : vector<16x128xf32>
    %c0_5 = arith.constant 0 : index
    %c0_6 = arith.constant 0 : index
    %7 = vector.load %arg4[%c0_5, %c0_6] : memref<1x128xf32, #tpu.memory_space<vmem>>, vector<1x128xf32>
    %c0_7 = arith.constant 0 : index
    %c0_8 = arith.constant 0 : index
    %8 = vector.load %arg5[%c0_7, %c0_8] : memref<1x128xf32, #tpu.memory_space<vmem>>, vector<1x128xf32>
    %cst_9 = arith.constant dense<0.000000e+00> : vector<16xf32>
    %9 = vector.multi_reduction <add>, %6, %cst_9 [1] : vector<16x128xf32> to vector<16xf32>
    %10 = vector.shape_cast %9 : vector<16xf32> to vector<16x1xf32>
    %cst_10 = arith.constant 3.125000e-02 : f32
    %11 = vector.broadcast %cst_10 : f32 to vector<16x1xf32>
    %12 = arith.mulf %10, %11 : vector<16x1xf32>
    %13 = vector.broadcast %12 : vector<16x1xf32> to vector<16x128xf32>
    %14 = arith.subf %6, %13 : vector<16x128xf32>
    %15 = tpu.iota {dimensions = array<i32: 1>} : vector<16x128xi32>
    %c32_i32 = arith.constant 32 : i32
    %16 = vector.broadcast %c32_i32 : i32 to vector<16x128xi32>
    %17 = arith.cmpi slt, %15, %16 : vector<16x128xi32>
    %cst_11 = arith.constant 0.000000e+00 : f32
    %18 = vector.broadcast %cst_11 : f32 to vector<16x128xf32>
    %19 = arith.select %17, %14, %18 : vector<16x128xi1>, vector<16x128xf32>
    %20 = arith.mulf %19, %19 : vector<16x128xf32>
    %cst_12 = arith.constant dense<0.000000e+00> : vector<16xf32>
    %21 = vector.multi_reduction <add>, %20, %cst_12 [1] : vector<16x128xf32> to vector<16xf32>
    %22 = vector.shape_cast %21 : vector<16xf32> to vector<16x1xf32>
    %cst_13 = arith.constant 3.125000e-02 : f32
    %23 = vector.broadcast %cst_13 : f32 to vector<16x1xf32>
    %24 = arith.mulf %22, %23 : vector<16x1xf32>
    %cst_14 = arith.constant 9.99999996E-13 : f32
    %25 = vector.broadcast %cst_14 : f32 to vector<16x1xf32>
    %26 = arith.addf %24, %25 : vector<16x1xf32>
    %27 = math.rsqrt %26 : vector<16x1xf32>
    %28 = vector.broadcast %27 : vector<16x1xf32> to vector<16x128xf32>
    %29 = arith.mulf %19, %28 : vector<16x128xf32>
    %30 = vector.broadcast %7 : vector<1x128xf32> to vector<16x128xf32>
    %31 = arith.mulf %29, %30 : vector<16x128xf32>
    %32 = vector.broadcast %8 : vector<1x128xf32> to vector<16x128xf32>
    %33 = arith.addf %31, %32 : vector<16x128xf32>
    %c0_15 = arith.constant 0 : index
    %c0_16 = arith.constant 0 : index
    %34 = vector.load %arg6[%c0_15, %c0_16] : memref<16x128xf32, #tpu.memory_space<vmem>>, vector<16x128xf32>
    tpu.vector_store %arg6[%c0_15, %c0_16], %33 {strides = array<i32>} : memref<16x128xf32, #tpu.memory_space<vmem>>, vector<16x128xf32>,
    return
  }
  func.func @transform_0(%arg0: i32) -> (i32, i32) {
    %c0_i32 = arith.constant 0 : i32
    %c0_i32_0 = arith.constant 0 : i32
    return %arg0, %c0_i32 : i32, i32
  }
  func.func @transform_1(%arg0: i32) -> (i32, i32) {
    %c0_i32 = arith.constant 0 : i32
    %c0_i32_0 = arith.constant 0 : i32
    %c0_i32_1 = arith.constant 0 : i32
    return %c0_i32, %c0_i32_0 : i32, i32
  }
  func.func @transform_2(%arg0: i32) -> (i32, i32) {
    %c0_i32 = arith.constant 0 : i32
    %c0_i32_0 = arith.constant 0 : i32
    %c0_i32_1 = arith.constant 0 : i32
    return %c0_i32, %c0_i32_0 : i32, i32
  }
  func.func @transform_3(%arg0: i32) -> (i32, i32) {
    %c0_i32 = arith.constant 0 : i32
    %c0_i32_0 = arith.constant 0 : i32
    %c0_i32_1 = arith.constant 0 : i32
    return %c0_i32, %c0_i32_0 : i32, i32
  }
  func.func @transform_4(%arg0: i32) -> (i32, i32) {
    %c0_i32 = arith.constant 0 : i32
    %c0_i32_0 = arith.constant 0 : i32
    %c0_i32_1 = arith.constant 0 : i32
    return %c0_i32, %c0_i32_0 : i32, i32
  }
  func.func @transform_5(%arg0: i32) -> (i32, i32) {
    %c0_i32 = arith.constant 0 : i32
    %c0_i32_0 = arith.constant 0 : i32
    return %arg0, %c0_i32 : i32, i32
  }
}

module attributes {stable_mosaic.version = 11 : i64} {
  func.func @_param_output2_resident_kernel(%arg0: i32, %arg1: memref<16x128xf32, #tpu.memory_space<vmem>>, %arg2: memref<128x128xf32, #tpu.memory_space<vmem>>, %arg3: memref<1x128xf32, #tpu.memory_space<vmem>>, %arg4: memref<1x128xf32, #tpu.memory_space<vmem>>, %arg5: memref<1x128xf32, #tpu.memory_space<vmem>>, %arg6: memref<16x128xf32, #tpu.memory_space<vmem>>) attributes {dimension_semantics = [#tpu.dimension_semantics<parallel>], iteration_bounds = array<i64: 1>, scalar_prefetch = 0 : i64, scratch_operands = 0 : i64, tpu.core_type = #tpu.core_type<tc>, window_params = [{transform_indices = @transform_0, window_bounds = array<i64: 16, 128>}, {pipeline_mode = #tpu.pipeline_mode<synchronous>, transform_indices = @transform_1, window_bounds = array<i64: 128, 128>}, {pipeline_mode = #tpu.pipeline_mode<synchronous>, transform_indices = @transform_2, window_bounds = array<i64: 1, 128>}, {pipeline_mode = #tpu.pipeline_mode<synchronous>, transform_indices = @transform_3, window_bounds = array<i64: 1, 128>}, {pipeline_mode = #tpu.pipeline_mode<synchronous>, transform_indices = @transform_4, window_bounds = array<i64: 1, 128>}, {transform_indices = @transform_5, window_bounds = array<i64: 16, 128>}]} {
    %c0 = arith.constant 0 : index
    %c0_0 = arith.constant 0 : index
    %0 = vector.load %arg1[%c0, %c0_0] : memref<16x128xf32, #tpu.memory_space<vmem>>, vector<16x128xf32>
    %c0_1 = arith.constant 0 : index
    %c0_2 = arith.constant 0 : index
    %1 = vector.load %arg2[%c0_1, %c0_2] : memref<128x128xf32, #tpu.memory_space<vmem>>, vector<128x128xf32>
    %cst = arith.constant dense<0.000000e+00> : vector<16x128xf32>
    %2 = tpu.matmul %0, %1, %cst {dimension_numbers = #tpu.dot_dimension_numbers<[1], [0], [0], [1], [0, 0, 1, 1], [], []>} : vector<16x128xf32>, vector<128x128xf32>, vector<16x128xf32> -> vector<16x128xf32>
    %c0_3 = arith.constant 0 : index
    %c0_4 = arith.constant 0 : index
    %3 = vector.load %arg3[%c0_3, %c0_4] : memref<1x128xf32, #tpu.memory_space<vmem>>, vector<1x128xf32>
    %4 = vector.broadcast %3 : vector<1x128xf32> to vector<16x128xf32>
    %5 = arith.addf %2, %4 : vector<16x128xf32>
    %6 = arith.addf %5, %0 : vector<16x128xf32>
    %c0_5 = arith.constant 0 : index
    %c0_6 = arith.constant 0 : index
    %7 = vector.load %arg4[%c0_5, %c0_6] : memref<1x128xf32, #tpu.memory_space<vmem>>, vector<1x128xf32>
    %c0_7 = arith.constant 0 : index
    %c0_8 = arith.constant 0 : index
    %8 = vector.load %arg5[%c0_7, %c0_8] : memref<1x128xf32, #tpu.memory_space<vmem>>, vector<1x128xf32>
    %cst_9 = arith.constant dense<0.000000e+00> : vector<16xf32>
    %9 = vector.multi_reduction <add>, %6, %cst_9 [1] : vector<16x128xf32> to vector<16xf32>
    %10 = vector.shape_cast %9 : vector<16xf32> to vector<16x1xf32>
    %cst_10 = arith.constant 3.125000e-02 : f32
    %11 = vector.broadcast %cst_10 : f32 to vector<16x1xf32>
    %12 = arith.mulf %10, %11 : vector<16x1xf32>
    %13 = vector.broadcast %12 : vector<16x1xf32> to vector<16x128xf32>
    %14 = arith.subf %6, %13 : vector<16x128xf32>
    %15 = tpu.iota {dimensions = array<i32: 1>} : vector<16x128xi32>
    %c32_i32 = arith.constant 32 : i32
    %16 = vector.broadcast %c32_i32 : i32 to vector<16x128xi32>
    %17 = arith.cmpi slt, %15, %16 : vector<16x128xi32>
    %cst_11 = arith.constant 0.000000e+00 : f32
    %18 = vector.broadcast %cst_11 : f32 to vector<16x128xf32>
    %19 = arith.select %17, %14, %18 : vector<16x128xi1>, vector<16x128xf32>
    %20 = arith.mulf %19, %19 : vector<16x128xf32>
    %cst_12 = arith.constant dense<0.000000e+00> : vector<16xf32>
    %21 = vector.multi_reduction <add>, %20, %cst_12 [1] : vector<16x128xf32> to vector<16xf32>
    %22 = vector.shape_cast %21 : vector<16xf32> to vector<16x1xf32>
    %cst_13 = arith.constant 3.125000e-02 : f32
    %23 = vector.broadcast %cst_13 : f32 to vector<16x1xf32>
    %24 = arith.mulf %22, %23 : vector<16x1xf32>
    %cst_14 = arith.constant 9.99999996E-13 : f32
    %25 = vector.broadcast %cst_14 : f32 to vector<16x1xf32>
    %26 = arith.addf %24, %25 : vector<16x1xf32>
    %27 = math.rsqrt %26 : vector<16x1xf32>
    %28 = vector.broadcast %27 : vector<16x1xf32> to vector<16x128xf32>
    %29 = arith.mulf %19, %28 : vector<16x128xf32>
    %30 = vector.broadcast %7 : vector<1x128xf32> to vector<16x128xf32>
    %31 = arith.mulf %29, %30 : vector<16x128xf32>
    %32 = vector.broadcast %8 : vector<1x128xf32> to vector<16x128xf32>
    %33 = arith.addf %31, %32 : vector<16x128xf32>
    %c0_15 = arith.constant 0 : index
    %c0_16 = arith.constant 0 : index
    %34 = vector.load %arg6[%c0_15, %c0_16] : memref<16x128xf32, #tpu.memory_space<vmem>>, vector<16x128xf32>
    tpu.vector_store %arg6[%c0_15, %c0_16], %33 {strides = array<i32>} : memref<16x128xf32, #tpu.memory_space<vmem>>, vector<16x128xf32>,
    return
  }
  func.func @transform_0(%arg0: i32) -> (i32, i32) {
    %c0_i32 = arith.constant 0 : i32
    %c0_i32_0 = arith.constant 0 : i32
    return %arg0, %c0_i32 : i32, i32
  }
  func.func @transform_1(%arg0: i32) -> (i32, i32) {
    %c0_i32 = arith.constant 0 : i32
    %c0_i32_0 = arith.constant 0 : i32
    %c0_i32_1 = arith.constant 0 : i32
    return %c0_i32, %c0_i32_0 : i32, i32
  }
  func.func @transform_2(%arg0: i32) -> (i32, i32) {
    %c0_i32 = arith.constant 0 : i32
    %c0_i32_0 = arith.constant 0 : i32
    %c0_i32_1 = arith.constant 0 : i32
    return %c0_i32, %c0_i32_0 : i32, i32
  }
  func.func @transform_3(%arg0: i32) -> (i32, i32) {
    %c0_i32 = arith.constant 0 : i32
    %c0_i32_0 = arith.constant 0 : i32
    %c0_i32_1 = arith.constant 0 : i32
    return %c0_i32, %c0_i32_0 : i32, i32
  }
  func.func @transform_4(%arg0: i32) -> (i32, i32) {
    %c0_i32 = arith.constant 0 : i32
    %c0_i32_0 = arith.constant 0 : i32
    %c0_i32_1 = arith.constant 0 : i32
    return %c0_i32, %c0_i32_0 : i32, i32
  }
  func.func @transform_5(%arg0: i32) -> (i32, i32) {
    %c0_i32 = arith.constant 0 : i32
    %c0_i32_0 = arith.constant 0 : i32
    return %arg0, %c0_i32 : i32, i32
  }
}

</mosaic_0001>

<bundles_post_ra>
// kernel: tpu_custom_call.1
= control target key start
LH: loop header
LB: loop body
LE: loop exit
PB: predicated region body
PF: predicated region fallthrough
CT: control target
= control target key end

     0   :  { %10 = vsyncpa [#allocation3], 0  ;;  %s474_s0 = inlined_call_operand.hbm [shape: f32[16,128], index: 0, kind: input, shape index: {}]   ;;  %s475_s1 = inlined_call_operand.hbm [shape: f32[128,128], index: 1, kind: input, shape index: {}]   ;;  %s476_s2 = inlined_call_operand.vmem [shape: f32[1,128], index: 2, kind: input, shape index: {}]   ;;  %s477_s3 = inlined_call_operand.vmem [shape: f32[1,128], index: 3, kind: input, shape index: {}]   ;;  %s478_s4 = inlined_call_operand.vmem [shape: f32[1,128], index: 4, kind: input, shape index: {}]   ;;  %s479_s5 = inlined_call_operand.hbm [shape: f32[16,128], index: 5, kind: output, shape index: {}]  }
   0x1   :  { %11 = vsyncpa [#allocation6], 0 }
   0x2   :  { %12 = vsyncpa [#allocation4], 0  ;;  %s385_s18 = smov [#allocation2]   ;;  %s313_s22 = scalar_lea.hbm %s474_s0, 256 }
   0x3   :  { %s18_s19 = sshll.u32 %s385_s18, 4  ;;  %p314_p0 = scmp.ne.s32.totalorder %s474_s0, %s313_s22  ;;  %s19_s19 = int_to_ptr.vmem [resolvable:$true] %s18_s19 }
   0x4   :  { %p317_p1 = scmp.lt.u32.totalorder %s313_s22, %s474_s0 }
   0x6   :  { %p319_p2 = pnand %p317_p1, %p314_p0 }
   0x8   :  { %322 = shalt.err (!%p319_p2)
}
   0x9   :  { %s323_s27 = scalar_lea.vmem %s19_s19, 256  ;;  %p328_p4 = scmp.lt.s32.totalorder %s19_s19, %s19_s19 }
   0xa   :  { %p324_p3 = scmp.ne.s32.totalorder %s19_s19, %s323_s27  ;;  %p329_p5 = scmp.lt.s32.totalorder %s323_s27, %s323_s27 }
   0xc   :  { %p330_p6 = por %p329_p5, %p328_p4 }
   0xe   :  { %p331_p7 = pnand %p330_p6, %p324_p3 }
  0x10   :  { %334 = shalt.err (!%p331_p7)
}
  0x11   :  { %s386_s28 = smov 128   ;;  %s387_s29 = smov 8  }
  0x12   :  { %24 = dma.hbm_to_vmem [thread:$0]  %s474_s0, 256, %s19_s19, [#allocation3], %s386_s28, %s386_s28, %s387_s29  }
  0x13   :  { %s388_s7 = smov [#allocation5]   ;;  %s335_s11 = scalar_lea.hbm %s475_s1, 2048 }
  0x14   :  { %s30_s8 = sshll.u32 %s388_s7, 4  ;;  %p336_p8 = scmp.ne.s32.totalorder %s475_s1, %s335_s11  ;;  %s31_s8 = int_to_ptr.vmem [resolvable:$true] %s30_s8 }
  0x15   :  { %p339_p9 = scmp.lt.u32.totalorder %s335_s11, %s475_s1 }
  0x17   :  { %p341_p10 = pnand %p339_p9, %p336_p8 }
  0x19   :  { %344 = shalt.err (!%p341_p10)
}
  0x1a   :  { %s345_s16 = scalar_lea.vmem %s31_s8, 2048  ;;  %p350_p12 = scmp.lt.s32.totalorder %s31_s8, %s31_s8 }
  0x1b   :  { %p346_p11 = scmp.ne.s32.totalorder %s31_s8, %s345_s16  ;;  %p351_p13 = scmp.lt.s32.totalorder %s345_s16, %s345_s16 }
  0x1d   :  { %p352_p0 = por %p351_p13, %p350_p12 }
  0x1f   :  { %p353_p1 = pnand %p352_p0, %p346_p11 }
  0x21   :  { %356 = shalt.err (!%p353_p1)
}
  0x22   :  { %36 = dma.hbm_to_vmem [thread:$0]  %s475_s1, 2048, %s31_s8, [#allocation6], %s386_s28, %s386_s28, %s387_s29  }
  0x23   :  { %379 = dma.done.wait [#allocation3], 256  }
  0x24   :  { %380 = vsyncadd [#allocation3], 4294967040 }
  0x25   :  { %381 = dma.done.wait [#allocation6], 2048  }
  0x26   :  { %382 = vsyncadd [#allocation6], 4294965248  ;;  %v51_v0 = vld [vmem:[#allocation5] sm:$0xff]  ;;  %v52_v1 = vld [vmem:[#allocation5 + $0x8] sm:$0xff]  ;;  %v161_v33 = vlaneseq  ;;  %s389_s22 = smov [#allocation7]  }
  0x27   :  { %v53_v2 = vld [vmem:[#allocation5 + $0x10] sm:$0xff]  ;;  %v272_v3 = vpack.c.bf16 %v52_v1, %v51_v0  ;;  %v54_v4 = vld [vmem:[#allocation5 + $0x18] sm:$0xff]  ;;  %v55_v6 = vld [vmem:[#allocation5 + $0x20] sm:$0xff]  ;;  %s203_s23 = sshll.u32 %s389_s22, 4  ;;  %s204_s23 = int_to_ptr.vmem [resolvable:$true] %s203_s23 }
  0x28   :  { %v276_v5 = vpack.c.bf16 %v54_v4, %v53_v2  ;;  %v56_v7 = vld [vmem:[#allocation5 + $0x28] sm:$0xff]  ;;  %v49_v9 = vld [vmem:[#allocation2] sm:$0xff]  ;;  %v58_v11 = vld [vmem:[#allocation5 + $0x38] sm:$0xff]  ;;  %v162_v34 = vand.u32 127, %v161_v33  ;;  %s357_s24 = scalar_lea.vmem %s204_s23, 256  ;;  %p362_p3 = scmp.lt.s32.totalorder %s204_s23, %s204_s23 }
  0x29   :  { %273 = vmatprep.subr.bf16.mxu0 %v272_v3  ;;  %v280_v8 = vpack.c.bf16 %v56_v7, %v55_v6  ;;  %v57_v10 = vld [vmem:[#allocation5 + $0x30] sm:$0xff]  ;;  %269 = vmatprep.mubr.f32.mxu0 %v49_v9  ;;  %v59_v13 = vld [vmem:[#allocation5 + $0x40] sm:$0xff]  ;;  %v60_v14 = vld [vmem:[#allocation5 + $0x48] sm:$0xff]  ;;  %p358_p2 = scmp.ne.s32.totalorder %s204_s23, %s357_s24  ;;  %p363_p4 = scmp.lt.s32.totalorder %s357_s24, %s357_s24 }
  0x2a   :  { %275 = vmatpush3.bf16.msra.mxu0 %v272_v3  ;;  %v284_v12 = vpack.c.bf16 %v58_v11, %v57_v10  ;;  %v288_v15 = vpack.c.bf16 %v60_v14, %v59_v13  ;;  %v61_v16 = vld [vmem:[#allocation5 + $0x50] sm:$0xff]  ;;  %v62_v17 = vld [vmem:[#allocation5 + $0x58] sm:$0xff]  ;;  %v63_v19 = vld [vmem:[#allocation5 + $0x60] sm:$0xff]  ;;  %vm163_vm0 = vcmp.lt.s32.totalorder %v162_v34, 32 }
  0x2b   :  { %277 = vmatprep.subr.bf16.mxu0 %v276_v5  ;;  %v292_v18 = vpack.c.bf16 %v62_v17, %v61_v16  ;;  %v64_v20 = vld [vmem:[#allocation5 + $0x68] sm:$0xff]  ;;  %v65_v22 = vld [vmem:[#allocation5 + $0x70] sm:$0xff]  ;;  %v66_v23 = vld [vmem:[#allocation5 + $0x78] sm:$0xff]  ;;  %p364_p5 = por %p363_p4, %p362_p3 }
  0x2c   :  { %v296_v21 = vpack.c.bf16 %v64_v20, %v63_v19  ;;  %v300_v24 = vpack.c.bf16 %v66_v23, %v65_v22  ;;  %v50_v25 = vld [vmem:[#allocation2 + $0x8] sm:$0xff]  ;;  %v216_v26 = vld [vmem:[%s476_s2] ss:$0 sm:$0xff] }
  0x2d   :  { %v217_v52 = vld [vmem:[%s477_s3] ss:$0 sm:$0xff]  ;;  %p365_p6 = pnand %p364_p5, %p358_p2 }
  0x2e   :  { %279 = vmatpush3.bf16.msra.mxu0 %v276_v5  ;;  %v218_v54 = vld [vmem:[%s478_s4] ss:$0 sm:$0xff] }
  0x2f   :  { %281 = vmatprep.subr.bf16.mxu0 %v280_v8 }
  0x32   :  { %283 = vmatpush3.bf16.msra.mxu0 %v280_v8 }
  0x33   :  { %285 = vmatprep.subr.bf16.mxu0 %v284_v12 }
  0x36   :  { %287 = vmatpush3.bf16.msra.mxu0 %v284_v12 }
  0x37   :  { %289 = vmatprep.subr.bf16.mxu0 %v288_v15 }
  0x3a   :  { %291 = vmatpush3.bf16.msra.mxu0 %v288_v15 }
  0x3b   :  { %293 = vmatprep.subr.bf16.mxu0 %v292_v18 }
  0x3e   :  { %295 = vmatpush3.bf16.msra.mxu0 %v292_v18 }
  0x3f   :  { %297 = vmatprep.subr.bf16.mxu0 %v296_v21 }
  0x42   :  { %299 = vmatpush3.bf16.msra.mxu0 %v296_v21 }
  0x43   :  { %301 = vmatprep.subr.bf16.mxu0 %v300_v24 }
  0x46   :  { %303 = vmatpush3.bf16.msra.mxu0 %v300_v24 }
  0x49   :  { %270 = vmatmul.mubr.f32.vlgmr.msra.gmra.mrb[0].mxu0 %v50_v25 }
 0x11c   :  { %v271_v27 = vpop.f32.mrb[0].mxu0 }
 0x11d   :  { %v140_v28 = vpop.f32.mrb[1].mxu0  ;;  %v146_v30 = vadd.f32 %v271_v27, %v216_v26 }
 0x11e   :  { %v141_v29 = vadd.f32 %v216_v26, %v140_v28 }
 0x11f   :  { %v150_v32 = vadd.f32 %v146_v30, %v50_v25 }
 0x120   :  { %v149_v31 = vadd.f32 %v141_v29, %v49_v9 }
 0x122   :  { %153 = vadd.xlane.f32.xlu0 %v149_v31 }
 0x126   :  { %155 = vadd.xlane.f32.xlu0 %v150_v32 }
 0x1af   :  { %v154_v35 = vpop.xlane.xlu0 %153 }
 0x1b0   :  { %v157_v36 = vmul.f32 0.03125, %v154_v35 }
 0x1b2   :  { %v159_v37 = vsub.f32 %v149_v31, %v157_v36 }
 0x1b3   :  { %v156_v38 = vpop.xlane.xlu0 %155 }
 0x1b4   :  { %v158_v39 = vmul.f32 0.03125, %v156_v38  ;;  %v164_v40 = vsel %vm163_vm0, %v159_v37, 0.0 }
 0x1b5   :  { %v166_v41 = vmul.f32 %v164_v40, %v164_v40 }
 0x1b6   :  { %v160_v42 = vsub.f32 %v150_v32, %v158_v39 }
 0x1b7   :  { %168 = vadd.xlane.f32.xlu1 %v166_v41 }
 0x1b8   :  { %v165_v43 = vsel %vm163_vm0, %v160_v42, 0.0 }
 0x1b9   :  { %v167_v44 = vmul.f32 %v165_v43, %v165_v43 }
 0x1bb   :  { %170 = vadd.xlane.f32.xlu1 %v167_v44 }
 0x244   :  { %v169_v45 = vpop.xlane.xlu1 %168 }
 0x245   :  { %v172_v46 = vmul.f32 0.03125, %v169_v45 }
 0x247   :  { %v174_v47 = vadd.f32 1e-12, %v172_v46 }
 0x248   :  { %v171_v48 = vpop.xlane.xlu1 %170 }
 0x249   :  { %309 = vrsqrt.f32 %v174_v47  ;;  %v173_v49 = vmul.f32 0.03125, %v171_v48 }
 0x24b   :  { %v175_v50 = vadd.f32 1e-12, %v173_v49 }
 0x24d   :  { %311 = vrsqrt.f32 %v175_v50 }
 0x253   :  { %v310_v51 = vpop.eup %309 }
 0x254   :  { %v178_v53 = vmul.f32 %v310_v51, %v164_v40 }
 0x256   :  { %v186_v55 = vmul.f32 %v217_v52, %v178_v53 }
 0x257   :  { %v312_v56 = vpop.eup %311 }
 0x258   :  { %v179_v57 = vmul.f32 %v312_v56, %v165_v43  ;;  %v194_v58 = vadd.f32 %v218_v54, %v186_v55 }
 0x25a   :  { %v187_v59 = vmul.f32 %v217_v52, %v179_v57  ;;  %196 = vst [vmem:[#allocation7] sm:$0xff] %v194_v58 }
 0x25c   :  { %v195_v60 = vadd.f32 %v218_v54, %v187_v59 }
 0x25e   :  { %197 = vst [vmem:[#allocation7 + $0x8] sm:$0xff] %v195_v60 }
 0x25f   :  { %368 = shalt.err (!%p365_p6)
}
 0x260   :  { %s369_s25 = scalar_lea.hbm %s479_s5, 256 }
 0x261   :  { %p370_p7 = scmp.ne.s32.totalorder %s479_s5, %s369_s25  ;;  %p373_p8 = scmp.lt.u32.totalorder %s369_s25, %s479_s5 }
 0x263   :  { %p375_p9 = pnand %p373_p8, %p370_p7 }
 0x265   :  { %378 = shalt.err (!%p375_p9)
}
 0x266   :  { %209 = dma.vmem_to_hbm [thread:$0]  %s204_s23, 256, %s479_s5, [#allocation4], %s386_s28, %s386_s28, %s387_s29  }
 0x267   :  { %383 = dma.done.wait [#allocation4], 256  }
 0x268   :  { %384 = vsyncadd [#allocation4], 4294967040 }
 0x269   :  { %213 = vsyncpa [#allocation3], 1 }
 0x26a   :  { %214 = vsyncpa [#allocation6], 1 }
 0x26b   :  { %215 = vsyncpa [#allocation4], 1 }

// kernel: tpu_custom_call.1
= control target key start
LH: loop header
LB: loop body
LE: loop exit
PB: predicated region body
PF: predicated region fallthrough
CT: control target
= control target key end

     0   :  { %10 = vsyncpa [#allocation3], 0  ;;  %s474_s0 = inlined_call_operand.hbm [shape: f32[16,128], index: 0, kind: input, shape index: {}]   ;;  %s475_s1 = inlined_call_operand.hbm [shape: f32[128,128], index: 1, kind: input, shape index: {}]   ;;  %s476_s2 = inlined_call_operand.vmem [shape: f32[1,128], index: 2, kind: input, shape index: {}]   ;;  %s477_s3 = inlined_call_operand.vmem [shape: f32[1,128], index: 3, kind: input, shape index: {}]   ;;  %s478_s4 = inlined_call_operand.vmem [shape: f32[1,128], index: 4, kind: input, shape index: {}]   ;;  %s479_s5 = inlined_call_operand.hbm [shape: f32[16,128], index: 5, kind: output, shape index: {}]  }
   0x1   :  { %11 = vsyncpa [#allocation6], 0 }
   0x2   :  { %12 = vsyncpa [#allocation4], 0  ;;  %s385_s18 = smov [#allocation2]   ;;  %s313_s22 = scalar_lea.hbm %s474_s0, 256 }
   0x3   :  { %s18_s19 = sshll.u32 %s385_s18, 4  ;;  %p314_p0 = scmp.ne.s32.totalorder %s474_s0, %s313_s22  ;;  %s19_s19 = int_to_ptr.vmem [resolvable:$true] %s18_s19 }
   0x4   :  { %p317_p1 = scmp.lt.u32.totalorder %s313_s22, %s474_s0 }
   0x6   :  { %p319_p2 = pnand %p317_p1, %p314_p0 }
   0x8   :  { %322 = shalt.err (!%p319_p2)
}
   0x9   :  { %s323_s27 = scalar_lea.vmem %s19_s19, 256  ;;  %p328_p4 = scmp.lt.s32.totalorder %s19_s19, %s19_s19 }
   0xa   :  { %p324_p3 = scmp.ne.s32.totalorder %s19_s19, %s323_s27  ;;  %p329_p5 = scmp.lt.s32.totalorder %s323_s27, %s323_s27 }
   0xc   :  { %p330_p6 = por %p329_p5, %p328_p4 }
   0xe   :  { %p331_p7 = pnand %p330_p6, %p324_p3 }
  0x10   :  { %334 = shalt.err (!%p331_p7)
}
  0x11   :  { %s386_s28 = smov 128   ;;  %s387_s29 = smov 8  }
  0x12   :  { %24 = dma.hbm_to_vmem [thread:$0]  %s474_s0, 256, %s19_s19, [#allocation3], %s386_s28, %s386_s28, %s387_s29  }
  0x13   :  { %s388_s7 = smov [#allocation5]   ;;  %s335_s11 = scalar_lea.hbm %s475_s1, 2048 }
  0x14   :  { %s30_s8 = sshll.u32 %s388_s7, 4  ;;  %p336_p8 = scmp.ne.s32.totalorder %s475_s1, %s335_s11  ;;  %s31_s8 = int_to_ptr.vmem [resolvable:$true] %s30_s8 }
  0x15   :  { %p339_p9 = scmp.lt.u32.totalorder %s335_s11, %s475_s1 }
  0x17   :  { %p341_p10 = pnand %p339_p9, %p336_p8 }
  0x19   :  { %344 = shalt.err (!%p341_p10)
}
  0x1a   :  { %s345_s16 = scalar_lea.vmem %s31_s8, 2048  ;;  %p350_p12 = scmp.lt.s32.totalorder %s31_s8, %s31_s8 }
  0x1b   :  { %p346_p11 = scmp.ne.s32.totalorder %s31_s8, %s345_s16  ;;  %p351_p13 = scmp.lt.s32.totalorder %s345_s16, %s345_s16 }
  0x1d   :  { %p352_p0 = por %p351_p13, %p350_p12 }
  0x1f   :  { %p353_p1 = pnand %p352_p0, %p346_p11 }
  0x21   :  { %356 = shalt.err (!%p353_p1)
}
  0x22   :  { %36 = dma.hbm_to_vmem [thread:$0]  %s475_s1, 2048, %s31_s8, [#allocation6], %s386_s28, %s386_s28, %s387_s29  }
  0x23   :  { %379 = dma.done.wait [#allocation3], 256  }
  0x24   :  { %380 = vsyncadd [#allocation3], 4294967040 }
  0x25   :  { %381 = dma.done.wait [#allocation6], 2048  }
  0x26   :  { %382 = vsyncadd [#allocation6], 4294965248  ;;  %v51_v0 = vld [vmem:[#allocation5] sm:$0xff]  ;;  %v52_v1 = vld [vmem:[#allocation5 + $0x8] sm:$0xff]  ;;  %v161_v33 = vlaneseq  ;;  %s389_s22 = smov [#allocation7]  }
  0x27   :  { %v53_v2 = vld [vmem:[#allocation5 + $0x10] sm:$0xff]  ;;  %v272_v3 = vpack.c.bf16 %v52_v1, %v51_v0  ;;  %v54_v4 = vld [vmem:[#allocation5 + $0x18] sm:$0xff]  ;;  %v55_v6 = vld [vmem:[#allocation5 + $0x20] sm:$0xff]  ;;  %s203_s23 = sshll.u32 %s389_s22, 4  ;;  %s204_s23 = int_to_ptr.vmem [resolvable:$true] %s203_s23 }
  0x28   :  { %v276_v5 = vpack.c.bf16 %v54_v4, %v53_v2  ;;  %v56_v7 = vld [vmem:[#allocation5 + $0x28] sm:$0xff]  ;;  %v49_v9 = vld [vmem:[#allocation2] sm:$0xff]  ;;  %v58_v11 = vld [vmem:[#allocation5 + $0x38] sm:$0xff]  ;;  %v162_v34 = vand.u32 127, %v161_v33  ;;  %s357_s24 = scalar_lea.vmem %s204_s23, 256  ;;  %p362_p3 = scmp.lt.s32.totalorder %s204_s23, %s204_s23 }
  0x29   :  { %273 = vmatprep.subr.bf16.mxu0 %v272_v3  ;;  %v280_v8 = vpack.c.bf16 %v56_v7, %v55_v6  ;;  %v57_v10 = vld [vmem:[#allocation5 + $0x30] sm:$0xff]  ;;  %269 = vmatprep.mubr.f32.mxu0 %v49_v9  ;;  %v59_v13 = vld [vmem:[#allocation5 + $0x40] sm:$0xff]  ;;  %v60_v14 = vld [vmem:[#allocation5 + $0x48] sm:$0xff]  ;;  %p358_p2 = scmp.ne.s32.totalorder %s204_s23, %s357_s24  ;;  %p363_p4 = scmp.lt.s32.totalorder %s357_s24, %s357_s24 }
  0x2a   :  { %275 = vmatpush3.bf16.msra.mxu0 %v272_v3  ;;  %v284_v12 = vpack.c.bf16 %v58_v11, %v57_v10  ;;  %v288_v15 = vpack.c.bf16 %v60_v14, %v59_v13  ;;  %v61_v16 = vld [vmem:[#allocation5 + $0x50] sm:$0xff]  ;;  %v62_v17 = vld [vmem:[#allocation5 + $0x58] sm:$0xff]  ;;  %v63_v19 = vld [vmem:[#allocation5 + $0x60] sm:$0xff]  ;;  %vm163_vm0 = vcmp.lt.s32.totalorder %v162_v34, 32 }
  0x2b   :  { %277 = vmatprep.subr.bf16.mxu0 %v276_v5  ;;  %v292_v18 = vpack.c.bf16 %v62_v17, %v61_v16  ;;  %v64_v20 = vld [vmem:[#allocation5 + $0x68] sm:$0xff]  ;;  %v65_v22 = vld [vmem:[#allocation5 + $0x70] sm:$0xff]  ;;  %v66_v23 = vld [vmem:[#allocation5 + $0x78] sm:$0xff]  ;;  %p364_p5 = por %p363_p4, %p362_p3 }
  0x2c   :  { %v296_v21 = vpack.c.bf16 %v64_v20, %v63_v19  ;;  %v300_v24 = vpack.c.bf16 %v66_v23, %v65_v22  ;;  %v50_v25 = vld [vmem:[#allocation2 + $0x8] sm:$0xff]  ;;  %v216_v26 = vld [vmem:[%s476_s2] ss:$0 sm:$0xff] }
  0x2d   :  { %v217_v52 = vld [vmem:[%s477_s3] ss:$0 sm:$0xff]  ;;  %p365_p6 = pnand %p364_p5, %p358_p2 }
  0x2e   :  { %279 = vmatpush3.bf16.msra.mxu0 %v276_v5  ;;  %v218_v54 = vld [vmem:[%s478_s4] ss:$0 sm:$0xff] }
  0x2f   :  { %281 = vmatprep.subr.bf16.mxu0 %v280_v8 }
  0x32   :  { %283 = vmatpush3.bf16.msra.mxu0 %v280_v8 }
  0x33   :  { %285 = vmatprep.subr.bf16.mxu0 %v284_v12 }
  0x36   :  { %287 = vmatpush3.bf16.msra.mxu0 %v284_v12 }
  0x37   :  { %289 = vmatprep.subr.bf16.mxu0 %v288_v15 }
  0x3a   :  { %291 = vmatpush3.bf16.msra.mxu0 %v288_v15 }
  0x3b   :  { %293 = vmatprep.subr.bf16.mxu0 %v292_v18 }
  0x3e   :  { %295 = vmatpush3.bf16.msra.mxu0 %v292_v18 }
  0x3f   :  { %297 = vmatprep.subr.bf16.mxu0 %v296_v21 }
  0x42   :  { %299 = vmatpush3.bf16.msra.mxu0 %v296_v21 }
  0x43   :  { %301 = vmatprep.subr.bf16.mxu0 %v300_v24 }
  0x46   :  { %303 = vmatpush3.bf16.msra.mxu0 %v300_v24 }
  0x49   :  { %270 = vmatmul.mubr.f32.vlgmr.msra.gmra.mrb[0].mxu0 %v50_v25 }
 0x11c   :  { %v271_v27 = vpop.f32.mrb[0].mxu0 }
 0x11d   :  { %v140_v28 = vpop.f32.mrb[1].mxu0  ;;  %v146_v30 = vadd.f32 %v271_v27, %v216_v26 }
 0x11e   :  { %v141_v29 = vadd.f32 %v216_v26, %v140_v28 }
 0x11f   :  { %v150_v32 = vadd.f32 %v146_v30, %v50_v25 }
 0x120   :  { %v149_v31 = vadd.f32 %v141_v29, %v49_v9 }
 0x122   :  { %153 = vadd.xlane.f32.xlu0 %v149_v31 }
 0x126   :  { %155 = vadd.xlane.f32.xlu0 %v150_v32 }
 0x1af   :  { %v154_v35 = vpop.xlane.xlu0 %153 }
 0x1b0   :  { %v157_v36 = vmul.f32 0.03125, %v154_v35 }
 0x1b2   :  { %v159_v37 = vsub.f32 %v149_v31, %v157_v36 }
 0x1b3   :  { %v156_v38 = vpop.xlane.xlu0 %155 }
 0x1b4   :  { %v158_v39 = vmul.f32 0.03125, %v156_v38  ;;  %v164_v40 = vsel %vm163_vm0, %v159_v37, 0.0 }
 0x1b5   :  { %v166_v41 = vmul.f32 %v164_v40, %v164_v40 }
 0x1b6   :  { %v160_v42 = vsub.f32 %v150_v32, %v158_v39 }
 0x1b7   :  { %168 = vadd.xlane.f32.xlu1 %v166_v41 }
 0x1b8   :  { %v165_v43 = vsel %vm163_vm0, %v160_v42, 0.0 }
 0x1b9   :  { %v167_v44 = vmul.f32 %v165_v43, %v165_v43 }
 0x1bb   :  { %170 = vadd.xlane.f32.xlu1 %v167_v44 }
 0x244   :  { %v169_v45 = vpop.xlane.xlu1 %168 }
 0x245   :  { %v172_v46 = vmul.f32 0.03125, %v169_v45 }
 0x247   :  { %v174_v47 = vadd.f32 1e-12, %v172_v46 }
 0x248   :  { %v171_v48 = vpop.xlane.xlu1 %170 }
 0x249   :  { %309 = vrsqrt.f32 %v174_v47  ;;  %v173_v49 = vmul.f32 0.03125, %v171_v48 }
 0x24b   :  { %v175_v50 = vadd.f32 1e-12, %v173_v49 }
 0x24d   :  { %311 = vrsqrt.f32 %v175_v50 }
 0x253   :  { %v310_v51 = vpop.eup %309 }
 0x254   :  { %v178_v53 = vmul.f32 %v310_v51, %v164_v40 }
 0x256   :  { %v186_v55 = vmul.f32 %v217_v52, %v178_v53 }
 0x257   :  { %v312_v56 = vpop.eup %311 }
 0x258   :  { %v179_v57 = vmul.f32 %v312_v56, %v165_v43  ;;  %v194_v58 = vadd.f32 %v218_v54, %v186_v55 }
 0x25a   :  { %v187_v59 = vmul.f32 %v217_v52, %v179_v57  ;;  %196 = vst [vmem:[#allocation7] sm:$0xff] %v194_v58 }
 0x25c   :  { %v195_v60 = vadd.f32 %v218_v54, %v187_v59 }
 0x25e   :  { %197 = vst [vmem:[#allocation7 + $0x8] sm:$0xff] %v195_v60 }
 0x25f   :  { %368 = shalt.err (!%p365_p6)
}
 0x260   :  { %s369_s25 = scalar_lea.hbm %s479_s5, 256 }
 0x261   :  { %p370_p7 = scmp.ne.s32.totalorder %s479_s5, %s369_s25  ;;  %p373_p8 = scmp.lt.u32.totalorder %s369_s25, %s479_s5 }
 0x263   :  { %p375_p9 = pnand %p373_p8, %p370_p7 }
 0x265   :  { %378 = shalt.err (!%p375_p9)
}
 0x266   :  { %209 = dma.vmem_to_hbm [thread:$0]  %s204_s23, 256, %s479_s5, [#allocation4], %s386_s28, %s386_s28, %s387_s29  }
 0x267   :  { %383 = dma.done.wait [#allocation4], 256  }
 0x268   :  { %384 = vsyncadd [#allocation4], 4294967040 }
 0x269   :  { %213 = vsyncpa [#allocation3], 1 }
 0x26a   :  { %214 = vsyncpa [#allocation6], 1 }
 0x26b   :  { %215 = vsyncpa [#allocation4], 1 }

</bundles_post_ra>
